<compile_context>
chip_gen: v6e
topology: v6e:2x2x1
jax: 0.10.0
libtpu: 0.0.40
codegen_flags: <defaults>
</compile_context>

<pallas_src>
import functools

import jax
import jax.numpy as jnp
from jax.experimental import pallas as pl
from jax.experimental.pallas import tpu as pltpu


def offset_head_kernel(xflat_ref, w1t_ref, bias_ref, w2t_ref, b2_ref, out_ref,
                       patches_ref, *, wp, p_pad):
    """One grid step = Bt images.

    xflat_ref  : (Bt, Cin, Lp_pad) bf16  NCHW input, (H,W) flattened on lanes, halo'd
    w1t_ref    : (Cmid, 9*Cin)     bf16  3x3 weights, BN scale folded, (dy,dx,c) cols
    bias_ref   : (Cmid, 1)         f32   folded BN shift
    w2t_ref    : (2, Cmid)         bf16  1x1 conv weights (transposed)
    b2_ref     : (2, 1)            f32   1x1 conv bias
    out_ref    : (Bt, 2, P_pad)    f32   channel-major output (lane-dense)
    patches_ref: (9*Cin, Bt*P_pad) bf16  im2col scratch, Bt images stacked on lanes
    """
    bt = xflat_ref.shape[0]
    cin = xflat_ref.shape[1]

    # im2col for all Bt images: tap (dy,dx) of image b is a contiguous lane
    # slice of its flattened padded image at offset dy*wp+dx.  Destination
    # columns start at b*p_pad (128-aligned) and have width p_pad (multiple of
    # 128), so every store is a full, unmasked lane-dense write.
    for b in range(bt):
        for dy in range(3):
            for dx in range(3):
                k = dy * 3 + dx
                off = dy * wp + dx
                patches_ref[k * cin:(k + 1) * cin,
                            b * p_pad:(b + 1) * p_pad] = (
                    xflat_ref[b, :, off:off + p_pad])

    # 3x3 conv for the WHOLE block as one fat MXU matmul (BN scale already
    # folded into w1t), then folded-BN bias + ReLU in f32.
    y = jnp.dot(w1t_ref[...], patches_ref[...],
                preferred_element_type=jnp.float32)            # (Cmid, Bt*P_pad)
    y = jnp.maximum(y + bias_ref[...], 0.0)

    # 1x1 conv + bias, again one matmul for the whole block.
    z = jnp.dot(w2t_ref[...], y.astype(w2t_ref.dtype),
                preferred_element_type=jnp.float32) + b2_ref[...]  # (2, Bt*P_pad)

    # Per-image, lane-aligned, full-width stores (channel-major output).
    for b in range(bt):
        out_ref[b] = z[:, b * p_pad:(b + 1) * p_pad]


def _round_up(x, m):
    return -(-x // m) * m


def _tpu_vmem_bytes():
    """Physical VMEM per core; conservative (v7x) default if the query fails."""
    try:
        cap = getattr(pltpu.get_tpu_info(), "vmem_capacity_bytes", None)
        if cap:
            return int(cap)
    except Exception:
        pass
    return 64 << 20


def _pick_block_batch(B, Cin, Cmid, Lp_pad, P_pad, budget_bytes):
    """Largest Bt (<=16, and >=2 grid steps when B>=2) whose footprint fits."""
    def footprint(bt):
        in_tile = 2 * bt * _round_up(Cin, 16) * Lp_pad * 2      # dbl-buffered bf16 input
        patches = _round_up(9 * Cin, 16) * bt * P_pad * 2       # bf16 im2col scratch
        hidden = _round_up(Cmid, 8) * bt * P_pad * (4 + 2)      # f32 act + bf16 copy
        out_tile = 2 * bt * _round_up(2, 8) * P_pad * 4         # dbl-buffered f32 output
        return in_tile + patches + hidden + out_tile

    cap = min(B, 16)
    if B >= 2:
        cap = min(cap, pl.cdiv(B, 2))    # >=2 grid steps -> both v7x TCs busy
    for bt in range(cap, 0, -1):
        if footprint(bt) <= budget_bytes:
            return bt
    # TODO(synk): if even Bt=1 exceeds the budget (very large H*W), H-tile with
    #             a 1-row halo instead of falling back.
    return 1


def offset_head_forward(x_nchw, params):
    """OffsetHead forward.  x_nchw: (B, Cin, H, W) f32 -> (B, 2, H, W) f32."""
    w1, bn_gamma, bn_beta, bn_mean, bn_var, w2, b2 = (
        params["w1"], params["bn_gamma"], params["bn_beta"],
        params["bn_mean"], params["bn_var"], params["w2"], params["b2"])
    eps = 1e-5

    B, Cin, H, W = x_nchw.shape
    Cmid = w1.shape[3]
    Wp = W + 2                                   # row stride of the padded image
    P = H * Wp                                   # flattened output cols (2 junk/row)
    P_pad = _round_up(P, 128)                    # lane-dense per-image column count
    Lp_pad = _round_up(2 * Wp + 2 + P_pad, 128)  # padded flat input length per image

    # Fold eval-mode BN into the 3x3 conv: scale -> weights, shift -> bias.
    scale = bn_gamma / jnp.sqrt(bn_var + eps)
    bias_col = (bn_beta - bn_mean * scale).reshape(Cmid, 1).astype(jnp.float32)
    w1t = jnp.transpose(
        (w1 * scale[None, None, None, :]).reshape(9 * Cin, Cmid)
    ).astype(jnp.bfloat16)                       # (Cmid, 9*Cin), (dy,dx,c) columns
    w2t = jnp.transpose(w2).astype(jnp.bfloat16)            # (2, Cmid)
    b2_col = b2.reshape(2, 1).astype(jnp.float32)

    # 1-pixel zero halo, flatten (H,W) onto the lane axis, then pad the flat
    # axis so every tap slice of width P_pad stays in bounds (extra lanes only
    # feed output columns that the wrapper discards).
    xp = jnp.pad(x_nchw.astype(jnp.bfloat16), ((0, 0), (0, 0), (1, 1), (1, 1)))
    x_flat = xp.reshape(B, Cin, (H + 2) * Wp)
    x_flat = jnp.pad(x_flat, ((0, 0), (0, 0), (0, Lp_pad - (H + 2) * Wp)))

    # Generation-aware VMEM sizing (v5e/v6e: 128 MiB physical, v7x: 64 MiB).
    vmem_cap = _tpu_vmem_bytes()
    vmem_limit = int(min(vmem_cap * 3 // 4, 100 << 20))
    Bt = _pick_block_batch(B, Cin, Cmid, Lp_pad, P_pad,
                           budget_bytes=int(vmem_limit * 0.8))
    grid_b = pl.cdiv(B, Bt)
    B_pad = grid_b * Bt
    if B_pad != B:                               # cdiv grid: pad batch, drop later
        x_flat = jnp.pad(x_flat, ((0, B_pad - B), (0, 0), (0, 0)))

    out_flat = pl.pallas_call(
        functools.partial(offset_head_kernel, wp=Wp, p_pad=P_pad),
        out_shape=jax.ShapeDtypeStruct((B_pad, 2, P_pad), jnp.float32),
        grid=(grid_b,),
        in_specs=[
            pl.BlockSpec((Bt, Cin, Lp_pad), lambda i: (i, 0, 0)),
            pl.BlockSpec((Cmid, 9 * Cin), lambda i: (0, 0)),
            pl.BlockSpec((Cmid, 1), lambda i: (0, 0)),
            pl.BlockSpec((2, Cmid), lambda i: (0, 0)),
            pl.BlockSpec((2, 1), lambda i: (0, 0)),
        ],
        out_specs=pl.BlockSpec((Bt, 2, P_pad), lambda i: (i, 0, 0)),
        scratch_shapes=[pltpu.VMEM((9 * Cin, Bt * P_pad), jnp.bfloat16)],
        compiler_params=pltpu.CompilerParams(
            dimension_semantics=("parallel",),
            vmem_limit_bytes=vmem_limit),
    )(x_flat, w1t, bias_col, w2t, b2_col)

    # Strip batch/lane padding and the 2 junk columns per row; already NCHW.
    return out_flat[:B, :, :P].reshape(B, 2, H, Wp)[:, :, :, :W]


def make_params(key, in_channels):
    """Deterministic synthetic parameters matching OffsetHead.__init__ shapes."""
    k1, k2, k3, k4, k5, k6 = jax.random.split(key, 6)
    Cmid = 64
    # Conv2d(in_channels, 64, 3, padding=1, bias=False): stored HWIO (3,3,Cin,64).
    w1 = jax.random.normal(k1, (3, 3, in_channels, Cmid), jnp.float32) * 0.1
    # BatchNorm2d(64) parameters / running stats (eval mode).
    bn_gamma = 1.0 + 0.1 * jax.random.normal(k2, (Cmid,), jnp.float32)
    bn_beta = 0.1 * jax.random.normal(k3, (Cmid,), jnp.float32)
    bn_mean = 0.1 * jax.random.normal(k4, (Cmid,), jnp.float32)
    bn_var = jnp.abs(1.0 + 0.1 * jax.random.normal(k5, (Cmid,), jnp.float32))
    # Conv2d(64, 2, 1): torch weight (2,64,1,1) -> (64, 2); bias (2,).
    w2 = jax.random.normal(k6, (Cmid, 2), jnp.float32) * 0.1
    b2 = jnp.array([0.01, -0.02], jnp.float32)
    return dict(w1=w1, bn_gamma=bn_gamma, bn_beta=bn_beta, bn_mean=bn_mean,
                bn_var=bn_var, w2=w2, b2=b2)


def reference_forward(x_nchw, params):
    """Pure-JAX reference (lax.conv) for correctness checking."""
    eps = 1e-5
    x = jnp.transpose(x_nchw, (0, 2, 3, 1))  # NHWC
    y = jax.lax.conv_general_dilated(
        x, params["w1"], window_strides=(1, 1), padding="SAME",
        dimension_numbers=("NHWC", "HWIO", "NHWC"))
    scale = params["bn_gamma"] / jnp.sqrt(params["bn_var"] + eps)
    bias = params["bn_beta"] - params["bn_mean"] * scale
    y = y * scale + bias
    y = jnp.maximum(y, 0.0)
    y = jnp.einsum("bhwc,cn->bhwn", y, params["w2"]) + params["b2"]
    return jnp.transpose(y, (0, 3, 1, 2))


if __name__ == "__main__":
    key = jax.random.PRNGKey(0)
    kx, kp = jax.random.split(key)

    B, Cin, H, W = 4, 4, 16, 16
    x = jax.random.normal(kx, (B, Cin, H, W), jnp.float32)
    params = make_params(kp, Cin)

    out = offset_head_forward(x, params)
    out = jax.block_until_ready(out)

    ref = reference_forward(x, params)
    assert out.shape == (B, 2, H, W), out.shape
    # Kernel uses bf16 MXU operands; the f32 reference also runs its matmuls on
    # the MXU at DEFAULT precision, so tolerances are set for bf16 rounding.
    err = float(jnp.max(jnp.abs(out - ref)))
    assert jnp.allclose(out, ref, atol=2e-2, rtol=2e-2), err

    print("KERNEL_OK")
</pallas_src>

<mosaic_0001>
module attributes {stable_mosaic.version = 11 : i64} {
  func.func @offset_head_kernel(%arg0: i32, %arg1: memref<2x4x512xbf16, #tpu.memory_space<vmem>>, %arg2: memref<64x36xbf16, #tpu.memory_space<vmem>>, %arg3: memref<64x1xf32, #tpu.memory_space<vmem>>, %arg4: memref<2x64xbf16, #tpu.memory_space<vmem>>, %arg5: memref<2x1xf32, #tpu.memory_space<vmem>>, %arg6: memref<2x2x384xf32, #tpu.memory_space<vmem>>, %arg7: memref<36x768xbf16, #tpu.memory_space<vmem>>) attributes {dimension_semantics = [#tpu.dimension_semantics<parallel>], iteration_bounds = array<i64: 2>, scalar_prefetch = 0 : i64, scratch_operands = 1 : i64, tpu.core_type = #tpu.core_type<tc>, window_params = [{transform_indices = @transform_0, window_bounds = array<i64: 2, 4, 512>}, {pipeline_mode = #tpu.pipeline_mode<synchronous>, transform_indices = @transform_1, window_bounds = array<i64: 64, 36>}, {pipeline_mode = #tpu.pipeline_mode<synchronous>, transform_indices = @transform_2, window_bounds = array<i64: 64, 1>}, {pipeline_mode = #tpu.pipeline_mode<synchronous>, transform_indices = @transform_3, window_bounds = array<i64: 2, 64>}, {pipeline_mode = #tpu.pipeline_mode<synchronous>, transform_indices = @transform_4, window_bounds = array<i64: 2, 1>}, {transform_indices = @transform_5, window_bounds = array<i64: 2, 2, 384>}]} {
    %c0 = arith.constant 0 : index
    %c0_0 = arith.constant 0 : index
    %c0_1 = arith.constant 0 : index
    %0 = vector.load %arg1[%c0, %c0_0, %c0_1] : memref<2x4x512xbf16, #tpu.memory_space<vmem>>, vector<1x4x384xbf16>
    %1 = vector.shape_cast %0 : vector<1x4x384xbf16> to vector<4x384xbf16>
    %c0_2 = arith.constant 0 : index
    %c0_3 = arith.constant 0 : index
    %2 = vector.load %arg7[%c0_2, %c0_3] : memref<36x768xbf16, #tpu.memory_space<vmem>>, vector<4x384xbf16>
    tpu.vector_store %arg7[%c0_2, %c0_3], %1 {strides = array<i32>} : memref<36x768xbf16, #tpu.memory_space<vmem>>, vector<4x384xbf16>,
    %c0_4 = arith.constant 0 : index
    %c0_5 = arith.constant 0 : index
    %c1 = arith.constant 1 : index
    %3 = vector.load %arg1[%c0_4, %c0_5, %c1] : memref<2x4x512xbf16, #tpu.memory_space<vmem>>, vector<1x4x384xbf16>
    %4 = vector.shape_cast %3 : vector<1x4x384xbf16> to vector<4x384xbf16>
    %c4 = arith.constant 4 : index
    %c0_6 = arith.constant 0 : index
    %5 = vector.load %arg7[%c4, %c0_6] : memref<36x768xbf16, #tpu.memory_space<vmem>>, vector<4x384xbf16>
    tpu.vector_store %arg7[%c4, %c0_6], %4 {strides = array<i32>} : memref<36x768xbf16, #tpu.memory_space<vmem>>, vector<4x384xbf16>,
    %c0_7 = arith.constant 0 : index
    %c0_8 = arith.constant 0 : index
    %c2 = arith.constant 2 : index
    %6 = vector.load %arg1[%c0_7, %c0_8, %c2] : memref<2x4x512xbf16, #tpu.memory_space<vmem>>, vector<1x4x384xbf16>
    %7 = vector.shape_cast %6 : vector<1x4x384xbf16> to vector<4x384xbf16>
    %c8 = arith.constant 8 : index
    %c0_9 = arith.constant 0 : index
    %8 = vector.load %arg7[%c8, %c0_9] : memref<36x768xbf16, #tpu.memory_space<vmem>>, vector<4x384xbf16>
    tpu.vector_store %arg7[%c8, %c0_9], %7 {strides = array<i32>} : memref<36x768xbf16, #tpu.memory_space<vmem>>, vector<4x384xbf16>,
    %c0_10 = arith.constant 0 : index
    %c0_11 = arith.constant 0 : index
    %c18 = arith.constant 18 : index
    %9 = vector.load %arg1[%c0_10, %c0_11, %c18] : memref<2x4x512xbf16, #tpu.memory_space<vmem>>, vector<1x4x384xbf16>
    %10 = vector.shape_cast %9 : vector<1x4x384xbf16> to vector<4x384xbf16>
    %c12 = arith.constant 12 : index
    %c0_12 = arith.constant 0 : index
    %11 = vector.load %arg7[%c12, %c0_12] : memref<36x768xbf16, #tpu.memory_space<vmem>>, vector<4x384xbf16>
    tpu.vector_store %arg7[%c12, %c0_12], %10 {strides = array<i32>} : memref<36x768xbf16, #tpu.memory_space<vmem>>, vector<4x384xbf16>,
    %c0_13 = arith.constant 0 : index
    %c0_14 = arith.constant 0 : index
    %c19 = arith.constant 19 : index
    %12 = vector.load %arg1[%c0_13, %c0_14, %c19] : memref<2x4x512xbf16, #tpu.memory_space<vmem>>, vector<1x4x384xbf16>
    %13 = vector.shape_cast %12 : vector<1x4x384xbf16> to vector<4x384xbf16>
    %c16 = arith.constant 16 : index
    %c0_15 = arith.constant 0 : index
    %14 = vector.load %arg7[%c16, %c0_15] : memref<36x768xbf16, #tpu.memory_space<vmem>>, vector<4x384xbf16>
    tpu.vector_store %arg7[%c16, %c0_15], %13 {strides = array<i32>} : memref<36x768xbf16, #tpu.memory_space<vmem>>, vector<4x384xbf16>,
    %c0_16 = arith.constant 0 : index
    %c0_17 = arith.constant 0 : index
    %c20 = arith.constant 20 : index
    %15 = vector.load %arg1[%c0_16, %c0_17, %c20] : memref<2x4x512xbf16, #tpu.memory_space<vmem>>, vector<1x4x384xbf16>
    %16 = vector.shape_cast %15 : vector<1x4x384xbf16> to vector<4x384xbf16>
    %c20_18 = arith.constant 20 : index
    %c0_19 = arith.constant 0 : index
    %17 = vector.load %arg7[%c20_18, %c0_19] : memref<36x768xbf16, #tpu.memory_space<vmem>>, vector<4x384xbf16>
    tpu.vector_store %arg7[%c20_18, %c0_19], %16 {strides = array<i32>} : memref<36x768xbf16, #tpu.memory_space<vmem>>, vector<4x384xbf16>,
    %c0_20 = arith.constant 0 : index
    %c0_21 = arith.constant 0 : index
    %c36 = arith.constant 36 : index
    %18 = vector.load %arg1[%c0_20, %c0_21, %c36] : memref<2x4x512xbf16, #tpu.memory_space<vmem>>, vector<1x4x384xbf16>
    %19 = vector.shape_cast %18 : vector<1x4x384xbf16> to vector<4x384xbf16>
    %c24 = arith.constant 24 : index
    %c0_22 = arith.constant 0 : index
    %20 = vector.load %arg7[%c24, %c0_22] : memref<36x768xbf16, #tpu.memory_space<vmem>>, vector<4x384xbf16>
    tpu.vector_store %arg7[%c24, %c0_22], %19 {strides = array<i32>} : memref<36x768xbf16, #tpu.memory_space<vmem>>, vector<4x384xbf16>,
    %c0_23 = arith.constant 0 : index
    %c0_24 = arith.constant 0 : index
    %c37 = arith.constant 37 : index
    %21 = vector.load %arg1[%c0_23, %c0_24, %c37] : memref<2x4x512xbf16, #tpu.memory_space<vmem>>, vector<1x4x384xbf16>
    %22 = vector.shape_cast %21 : vector<1x4x384xbf16> to vector<4x384xbf16>
    %c28 = arith.constant 28 : index
    %c0_25 = arith.constant 0 : index
    %23 = vector.load %arg7[%c28, %c0_25] : memref<36x768xbf16, #tpu.memory_space<vmem>>, vector<4x384xbf16>
    tpu.vector_store %arg7[%c28, %c0_25], %22 {strides = array<i32>} : memref<36x768xbf16, #tpu.memory_space<vmem>>, vector<4x384xbf16>,
    %c0_26 = arith.constant 0 : index
    %c0_27 = arith.constant 0 : index
    %c38 = arith.constant 38 : index
    %24 = vector.load %arg1[%c0_26, %c0_27, %c38] : memref<2x4x512xbf16, #tpu.memory_space<vmem>>, vector<1x4x384xbf16>
    %25 = vector.shape_cast %24 : vector<1x4x384xbf16> to vector<4x384xbf16>
    %c32 = arith.constant 32 : index
    %c0_28 = arith.constant 0 : index
    %26 = vector.load %arg7[%c32, %c0_28] : memref<36x768xbf16, #tpu.memory_space<vmem>>, vector<4x384xbf16>
    tpu.vector_store %arg7[%c32, %c0_28], %25 {strides = array<i32>} : memref<36x768xbf16, #tpu.memory_space<vmem>>, vector<4x384xbf16>,
    %c1_29 = arith.constant 1 : index
    %c0_30 = arith.constant 0 : index
    %c0_31 = arith.constant 0 : index
    %27 = vector.load %arg1[%c1_29, %c0_30, %c0_31] : memref<2x4x512xbf16, #tpu.memory_space<vmem>>, vector<1x4x384xbf16>
    %28 = vector.shape_cast %27 : vector<1x4x384xbf16> to vector<4x384xbf16>
    %c0_32 = arith.constant 0 : index
    %c384 = arith.constant 384 : index
    %29 = vector.load %arg7[%c0_32, %c384] : memref<36x768xbf16, #tpu.memory_space<vmem>>, vector<4x384xbf16>
    tpu.vector_store %arg7[%c0_32, %c384], %28 {strides = array<i32>} : memref<36x768xbf16, #tpu.memory_space<vmem>>, vector<4x384xbf16>,
    %c1_33 = arith.constant 1 : index
    %c0_34 = arith.constant 0 : index
    %c1_35 = arith.constant 1 : index
    %30 = vector.load %arg1[%c1_33, %c0_34, %c1_35] : memref<2x4x512xbf16, #tpu.memory_space<vmem>>, vector<1x4x384xbf16>
    %31 = vector.shape_cast %30 : vector<1x4x384xbf16> to vector<4x384xbf16>
    %c4_36 = arith.constant 4 : index
    %c384_37 = arith.constant 384 : index
    %32 = vector.load %arg7[%c4_36, %c384_37] : memref<36x768xbf16, #tpu.memory_space<vmem>>, vector<4x384xbf16>
    tpu.vector_store %arg7[%c4_36, %c384_37], %31 {strides = array<i32>} : memref<36x768xbf16, #tpu.memory_space<vmem>>, vector<4x384xbf16>,
    %c1_38 = arith.constant 1 : index
    %c0_39 = arith.constant 0 : index
    %c2_40 = arith.constant 2 : index
    %33 = vector.load %arg1[%c1_38, %c0_39, %c2_40] : memref<2x4x512xbf16, #tpu.memory_space<vmem>>, vector<1x4x384xbf16>
    %34 = vector.shape_cast %33 : vector<1x4x384xbf16> to vector<4x384xbf16>
    %c8_41 = arith.constant 8 : index
    %c384_42 = arith.constant 384 : index
    %35 = vector.load %arg7[%c8_41, %c384_42] : memref<36x768xbf16, #tpu.memory_space<vmem>>, vector<4x384xbf16>
    tpu.vector_store %arg7[%c8_41, %c384_42], %34 {strides = array<i32>} : memref<36x768xbf16, #tpu.memory_space<vmem>>, vector<4x384xbf16>,
    %c1_43 = arith.constant 1 : index
    %c0_44 = arith.constant 0 : index
    %c18_45 = arith.constant 18 : index
    %36 = vector.load %arg1[%c1_43, %c0_44, %c18_45] : memref<2x4x512xbf16, #tpu.memory_space<vmem>>, vector<1x4x384xbf16>
    %37 = vector.shape_cast %36 : vector<1x4x384xbf16> to vector<4x384xbf16>
    %c12_46 = arith.constant 12 : index
    %c384_47 = arith.constant 384 : index
    %38 = vector.load %arg7[%c12_46, %c384_47] : memref<36x768xbf16, #tpu.memory_space<vmem>>, vector<4x384xbf16>
    tpu.vector_store %arg7[%c12_46, %c384_47], %37 {strides = array<i32>} : memref<36x768xbf16, #tpu.memory_space<vmem>>, vector<4x384xbf16>,
    %c1_48 = arith.constant 1 : index
    %c0_49 = arith.constant 0 : index
    %c19_50 = arith.constant 19 : index
    %39 = vector.load %arg1[%c1_48, %c0_49, %c19_50] : memref<2x4x512xbf16, #tpu.memory_space<vmem>>, vector<1x4x384xbf16>
    %40 = vector.shape_cast %39 : vector<1x4x384xbf16> to vector<4x384xbf16>
    %c16_51 = arith.constant 16 : index
    %c384_52 = arith.constant 384 : index
    %41 = vector.load %arg7[%c16_51, %c384_52] : memref<36x768xbf16, #tpu.memory_space<vmem>>, vector<4x384xbf16>
    tpu.vector_store %arg7[%c16_51, %c384_52], %40 {strides = array<i32>} : memref<36x768xbf16, #tpu.memory_space<vmem>>, vector<4x384xbf16>,
    %c1_53 = arith.constant 1 : index
    %c0_54 = arith.constant 0 : index
    %c20_55 = arith.constant 20 : index
    %42 = vector.load %arg1[%c1_53, %c0_54, %c20_55] : memref<2x4x512xbf16, #tpu.memory_space<vmem>>, vector<1x4x384xbf16>
    %43 = vector.shape_cast %42 : vector<1x4x384xbf16> to vector<4x384xbf16>
    %c20_56 = arith.constant 20 : index
    %c384_57 = arith.constant 384 : index
    %44 = vector.load %arg7[%c20_56, %c384_57] : memref<36x768xbf16, #tpu.memory_space<vmem>>, vector<4x384xbf16>
    tpu.vector_store %arg7[%c20_56, %c384_57], %43 {strides = array<i32>} : memref<36x768xbf16, #tpu.memory_space<vmem>>, vector<4x384xbf16>,
    %c1_58 = arith.constant 1 : index
    %c0_59 = arith.constant 0 : index
    %c36_60 = arith.constant 36 : index
    %45 = vector.load %arg1[%c1_58, %c0_59, %c36_60] : memref<2x4x512xbf16, #tpu.memory_space<vmem>>, vector<1x4x384xbf16>
    %46 = vector.shape_cast %45 : vector<1x4x384xbf16> to vector<4x384xbf16>
    %c24_61 = arith.constant 24 : index
    %c384_62 = arith.constant 384 : index
    %47 = vector.load %arg7[%c24_61, %c384_62] : memref<36x768xbf16, #tpu.memory_space<vmem>>, vector<4x384xbf16>
    tpu.vector_store %arg7[%c24_61, %c384_62], %46 {strides = array<i32>} : memref<36x768xbf16, #tpu.memory_space<vmem>>, vector<4x384xbf16>,
    %c1_63 = arith.constant 1 : index
    %c0_64 = arith.constant 0 : index
    %c37_65 = arith.constant 37 : index
    %48 = vector.load %arg1[%c1_63, %c0_64, %c37_65] : memref<2x4x512xbf16, #tpu.memory_space<vmem>>, vector<1x4x384xbf16>
    %49 = vector.shape_cast %48 : vector<1x4x384xbf16> to vector<4x384xbf16>
    %c28_66 = arith.constant 28 : index
    %c384_67 = arith.constant 384 : index
    %50 = vector.load %arg7[%c28_66, %c384_67] : memref<36x768xbf16, #tpu.memory_space<vmem>>, vector<4x384xbf16>
    tpu.vector_store %arg7[%c28_66, %c384_67], %49 {strides = array<i32>} : memref<36x768xbf16, #tpu.memory_space<vmem>>, vector<4x384xbf16>,
    %c1_68 = arith.constant 1 : index
    %c0_69 = arith.constant 0 : index
    %c38_70 = arith.constant 38 : index
    %51 = vector.load %arg1[%c1_68, %c0_69, %c38_70] : memref<2x4x512xbf16, #tpu.memory_space<vmem>>, vector<1x4x384xbf16>
    %52 = vector.shape_cast %51 : vector<1x4x384xbf16> to vector<4x384xbf16>
    %c32_71 = arith.constant 32 : index
    %c384_72 = arith.constant 384 : index
    %53 = vector.load %arg7[%c32_71, %c384_72] : memref<36x768xbf16, #tpu.memory_space<vmem>>, vector<4x384xbf16>
    tpu.vector_store %arg7[%c32_71, %c384_72], %52 {strides = array<i32>} : memref<36x768xbf16, #tpu.memory_space<vmem>>, vector<4x384xbf16>,
    %c0_73 = arith.constant 0 : index
    %c0_74 = arith.constant 0 : index
    %54 = vector.load %arg2[%c0_73, %c0_74] : memref<64x36xbf16, #tpu.memory_space<vmem>>, vector<64x36xbf16>
    %c0_75 = arith.constant 0 : index
    %c0_76 = arith.constant 0 : index
    %55 = vector.load %arg7[%c0_75, %c0_76] : memref<36x768xbf16, #tpu.memory_space<vmem>>, vector<36x768xbf16>
    %cst = arith.constant dense<0.000000e+00> : vector<64x768xf32>
    %56 = tpu.matmul %54, %55, %cst {dimension_numbers = #tpu.dot_dimension_numbers<[1], [0], [0], [1], [0, 0, 1, 1], [], []>} : vector<64x36xbf16>, vector<36x768xbf16>, vector<64x768xf32> -> vector<64x768xf32>
    %c0_77 = arith.constant 0 : index
    %c0_78 = arith.constant 0 : index
    %57 = vector.load %arg3[%c0_77, %c0_78] : memref<64x1xf32, #tpu.memory_space<vmem>>, vector<64x1xf32>
    %58 = vector.broadcast %57 : vector<64x1xf32> to vector<64x768xf32>
    %59 = arith.addf %56, %58 : vector<64x768xf32>
    %cst_79 = arith.constant 0.000000e+00 : f32
    %60 = vector.broadcast %cst_79 : f32 to vector<64x768xf32>
    %61 = arith.maximumf %59, %60 : vector<64x768xf32>
    %c0_80 = arith.constant 0 : index
    %c0_81 = arith.constant 0 : index
    %62 = vector.load %arg4[%c0_80, %c0_81] : memref<2x64xbf16, #tpu.memory_space<vmem>>, vector<2x64xbf16>
    %63 = arith.truncf %61 : vector<64x768xf32> to vector<64x768xbf16>
    %cst_82 = arith.constant dense<0.000000e+00> : vector<2x768xf32>
    %64 = tpu.matmul %62, %63, %cst_82 {dimension_numbers = #tpu.dot_dimension_numbers<[1], [0], [0], [1], [0, 0, 1, 1], [], []>} : vector<2x64xbf16>, vector<64x768xbf16>, vector<2x768xf32> -> vector<2x768xf32>
    %c0_83 = arith.constant 0 : index
    %c0_84 = arith.constant 0 : index
    %65 = vector.load %arg5[%c0_83, %c0_84] : memref<2x1xf32, #tpu.memory_space<vmem>>, vector<2x1xf32>
    %66 = vector.broadcast %65 : vector<2x1xf32> to vector<2x768xf32>
    %67 = arith.addf %64, %66 : vector<2x768xf32>
    %68 = vector.extract_strided_slice %67 {offsets = [0, 0], sizes = [2, 384], strides = [1, 1]} : vector<2x768xf32> to vector<2x384xf32>
    %c0_85 = arith.constant 0 : index
    %c0_86 = arith.constant 0 : index
    %c0_87 = arith.constant 0 : index
    %69 = vector.load %arg6[%c0_85, %c0_86, %c0_87] : memref<2x2x384xf32, #tpu.memory_space<vmem>>, vector<1x2x384xf32>
    %70 = vector.shape_cast %69 : vector<1x2x384xf32> to vector<2x384xf32>
    %71 = vector.shape_cast %68 : vector<2x384xf32> to vector<1x2x384xf32>
    tpu.vector_store %arg6[%c0_85, %c0_86, %c0_87], %71 {strides = array<i32>} : memref<2x2x384xf32, #tpu.memory_space<vmem>>, vector<1x2x384xf32>,
    %72 = vector.extract_strided_slice %67 {offsets = [0, 384], sizes = [2, 384], strides = [1, 1]} : vector<2x768xf32> to vector<2x384xf32>
    %c1_88 = arith.constant 1 : index
    %c0_89 = arith.constant 0 : index
    %c0_90 = arith.constant 0 : index
    %73 = vector.load %arg6[%c1_88, %c0_89, %c0_90] : memref<2x2x384xf32, #tpu.memory_space<vmem>>, vector<1x2x384xf32>
    %74 = vector.shape_cast %73 : vector<1x2x384xf32> to vector<2x384xf32>
    %75 = vector.shape_cast %72 : vector<2x384xf32> to vector<1x2x384xf32>
    tpu.vector_store %arg6[%c1_88, %c0_89, %c0_90], %75 {strides = array<i32>} : memref<2x2x384xf32, #tpu.memory_space<vmem>>, vector<1x2x384xf32>,
    return
  }
  func.func @transform_0(%arg0: i32) -> (i32, i32, i32) {
    %c0_i32 = arith.constant 0 : i32
    %c0_i32_0 = arith.constant 0 : i32
    %c0_i32_1 = arith.constant 0 : i32
    return %arg0, %c0_i32, %c0_i32_0 : i32, i32, i32
  }
  func.func @transform_1(%arg0: i32) -> (i32, i32) {
    %c0_i32 = arith.constant 0 : i32
    %c0_i32_0 = arith.constant 0 : i32
    %c0_i32_1 = arith.constant 0 : i32
    return %c0_i32, %c0_i32_0 : i32, i32
  }
  func.func @transform_2(%arg0: i32) -> (i32, i32) {
    %c0_i32 = arith.constant 0 : i32
    %c0_i32_0 = arith.constant 0 : i32
    %c0_i32_1 = arith.constant 0 : i32
    return %c0_i32, %c0_i32_0 : i32, i32
  }
  func.func @transform_3(%arg0: i32) -> (i32, i32) {
    %c0_i32 = arith.constant 0 : i32
    %c0_i32_0 = arith.constant 0 : i32
    %c0_i32_1 = arith.constant 0 : i32
    return %c0_i32, %c0_i32_0 : i32, i32
  }
  func.func @transform_4(%arg0: i32) -> (i32, i32) {
    %c0_i32 = arith.constant 0 : i32
    %c0_i32_0 = arith.constant 0 : i32
    %c0_i32_1 = arith.constant 0 : i32
    return %c0_i32, %c0_i32_0 : i32, i32
  }
  func.func @transform_5(%arg0: i32) -> (i32, i32, i32) {
    %c0_i32 = arith.constant 0 : i32
    %c0_i32_0 = arith.constant 0 : i32
    %c0_i32_1 = arith.constant 0 : i32
    return %arg0, %c0_i32, %c0_i32_0 : i32, i32, i32
  }
}

</mosaic_0001>

<bundles_post_ra>
// kernel: tpu_custom_call.1
= control target key start
LH: loop header
LB: loop body
LE: loop exit
PB: predicated region body
PF: predicated region fallthrough
CT: control target
= control target key end

     0   :  { %10 = vsyncpa [#allocation4], 0  ;;  %s2175_s0 = inlined_call_operand.vmem [shape: bf16[4,4,512], index: 0, kind: input, shape index: {}]   ;;  %s2176_s1 = inlined_call_operand.vmem [shape: bf16[64,36], index: 1, kind: input, shape index: {}]   ;;  %s2177_s2 = inlined_call_operand.vmem [shape: f32[64,1], index: 2, kind: input, shape index: {}]   ;;  %s2178_s3 = inlined_call_operand.vmem [shape: bf16[2,64], index: 3, kind: input, shape index: {}]   ;;  %s2179_s4 = inlined_call_operand.vmem [shape: f32[2,1], index: 4, kind: input, shape index: {}]   ;;  %s2180_s5 = inlined_call_operand.hbm [shape: f32[4,2,384], index: 5, kind: output, shape index: {}]  }
   0x1   :  { %12 = vsyncpa [#allocation4 + $0x1], 0  ;;  %s1763_s18 = smov 0   ;;  %s1765_s19 = smov 0  }
   0x2   :  { %s1767_s20 = smov 0   ;;  %s1769_s21 = smov 0  }
   0x3 LB: > { %s1784_s22 = sadd.s32 4294967295, %s1718_s21   ;;  %s1505_s23 = sadd.s32 4294967294, %s1718_s21   ;;  %s1718_s21 = sphi %s1769_s21, %s2186_s21   ;;  %s1714_s20 = sphi %s1767_s20, %s2185_s20   ;;  %s1710_s19 = sphi %s1765_s19, %s2184_s19   ;;  %s1706_s18 = sphi %s1763_s18, %s2183_s18  }
   0x4   : > { %s1788_s24 = sadd.s32 1, %s1718_s21   ;;  %s135_s25 = sadd.s32 1, %s1714_s20 }
   0x5   : > { %s132_s26 = ssub.s32 %s1718_s21, %s1788_s24  ;;  %p145_p0 = scmp.ne.s32.totalorder %s1714_s20, %s1710_s19 }
   0x6   : > { %p133_p1 = scmp.eq.s32.totalorder %s132_s26, 0  ;;  %p146_p2 = scmp.eq.s32.totalorder %s1784_s22, 1 }
   0x7   : > { %p151_p3 = scmp.ne.s32.totalorder %s1710_s19, %s1706_s18  ;;  %p152_p4 = scmp.eq.s32.totalorder %s1505_s23, 1 }
   0x8   : > { %s1799_s27 = scalar_select %p133_p1, %s1714_s20, %s135_s25  }
   0x9   : > { %p1801_p5 = por %p146_p2, %p145_p0  ;;  %p1805_p6 = por %p152_p4, %p151_p3 }
   0xa   : > { %p1508_p7 = scmp.ge.s32.totalorder %s1718_s21, 1  ;;  %p192_p8 = scmp.lt.s32.totalorder %s1718_s21, 3 }
   0xc   : > { %p193_p9 = pnand %p1508_p7, %p192_p8 }
   0xd   : > { %s1509_s30 = sshll.u32 (!%p193_p9), %s1784_s22, 1  ;;  %s1721_s10 = smov (!%p193_p9), 90  }
   0xe   : > { %196 = sbr.rel (%p193_p9) target bundleno = 682 (0x2aa), region = 40  ;;  %p222_p10 = scmp.lt.s32.totalorder (!%p193_p9), %s1509_s30, 3 }
   0xf   : > { %s1722_s11 = smov (!%p193_p9), 109   ;;  %s1723_s12 = smov (!%p193_p9), 92  }
  0x10   : > { %s1724_s13 = smov (!%p193_p9), 108   ;;  %s1725_s14 = smov (!%p193_p9), 91  }
  0x11   : > { %s1726_s15 = smov (!%p193_p9), 127   ;;  %s1727_s16 = smov (!%p193_p9), 126  }
  0x12   : > { %s1728_s17 = smov (!%p193_p9), 110   ;;  %s1573_s23 = smul.u32 (!%p193_p9), 192, %s1784_s22 }
  0x13   : > { %v257_v0 = vlaneseq  ;;  %v1720_v1 = vmov 1983009808   ;;  %s2188_s30 = smov (!%p222_p10, %s1509_s30), 3  ;;  %v1729_v17 = vmov 0   ;;  %v792_v23 = vld [vmem:[%s2177_s2 + $0x38] sm:$0xff]  ;;  %v791_v24 = vld [vmem:[%s2177_s2 + $0x30] sm:$0xff] }
  0x14   : > { %v255_v2 = vunpack.c.l.s4 %v1720_v1  ;;  %s1571_s6 = sshll.u32 %s2188_s30, 3  ;;  %992 = vmatprep.mubr.bf16.mxu0 %v1729_v17  ;;  %1065 = vmatprep.mubr.bf16.mxu1 %v1729_v17  ;;  %v789_v25 = vld [vmem:[%s2177_s2 + $0x20] sm:$0xff]  ;;  %v790_v26 = vld [vmem:[%s2177_s2 + $0x28] sm:$0xff]  ;;  %v787_v27 = vld [vmem:[%s2177_s2 + $0x10] sm:$0xff]  ;;  %vm400_vm0 = vcmask 883712   ;;  %vm274_vm1 = vcmask 1043456   ;;  %s2133_s30 = scalar_lea.hbm %s2180_s5, %s1573_s23 }
  0x15   : > { %v258_v3 = vshrl.u32 %v257_v0, 7  ;;  %s1817_s9 = scalar_lea.vmem %s2175_s0, %s1571_s6  ;;  %1626 = vset.pattern.permute.xlu1 %v1729_v17  ;;  %1625 = vset.pattern.permute.xlu0 %v1729_v17  ;;  %v788_v28 = vld [vmem:[%s2177_s2 + $0x18] sm:$0xff]  ;;  %v785_v29 = vld [vmem:[%s2177_s2] sm:$0xff]  ;;  %v786_v30 = vld [vmem:[%s2177_s2 + $0x8] sm:$0xff]  ;;  %vm493_vm2 = vcmask 736256   ;;  %vm369_vm3 = vcmask 891904  }
  0x16   : > { %v256_v4 = vunpack.c.0.s8 %v255_v2  ;;  %v469_v6 = vld [vmem:[%s1817_s9] sm:$0xff]  ;;  %v1524_v13 = vld [vmem:[%s1817_s9 + $0x8] sm:$0xff]  ;;  %vm431_vm4 = vcmask 752640   ;;  %vm462_vm5 = vcmask 744448   ;;  %vm276_vm6 = vcmask 1039360   ;;  %s1730_s7 = smov [#allocation3]  }
  0x17   : > { %v471_v8 = vcombine.high %v469_v6, %v469_v6  ;;  %v378_v10 = vcombine.low %v469_v6, %v469_v6  ;;  %v230_v12 = vld [vmem:[%s1817_s9] sm:$0x3f]  ;;  %v734_v14 = vcombine.high %v1524_v13, %v1524_v13  ;;  %v644_v18 = vcombine.low %v1524_v13, %v1524_v13  ;;  %v1514_v20 = vld [vmem:[%s1817_s9 + $0x8] sm:$0x3f]  ;;  %s1662_s8 = sshll.u32 %s1730_s7, 4  ;;  %s1663_s8 = int_to_ptr.vmem [resolvable:$false] %s1662_s8 }
  0x18   : > { %v1812_v5 = vsub.s32 %v256_v4, %v258_v3  ;;  %1512 = vst.sshfl [vmem:[#allocation2] sm:$0xf pattern:$0x76325410] %v230_v12  ;;  %v232_v21 = vcombine.high %v230_v12, %v230_v12  ;;  %v503_v22 = vcombine.high %v1514_v20, %v1514_v20  ;;  %v1252_v31 = vld [vmem:[%s2179_s4] sm:$0x3] }
  0x19   : > { %1515 = vst.sshfl [vmem:[#allocation2 + $0xc] sm:$0xf pattern:$0x76325410] %v1514_v20  ;;  %vm941_vm7 = vcmask 1041408   ;;  %vm307_vm8 = vcmask 1031168  }
  0x1a   : > { %v478_v7 = vrot.slane %v469_v6, %v1812_v5  ;;  %v485_v9 = vrot.slane %v471_v8, %v1812_v5  ;;  %v385_v11 = vrot.slane %v378_v10, %v1812_v5  ;;  %v748_v15 = vrot.slane %v734_v14, %v1812_v5  ;;  %1513 = vst.sshfl [vmem:[#allocation2 + $0x8] sm:$0x3 pattern:$0x76325410] %v232_v21  ;;  %s1664_s9 = scalar_lea.vmem %s1663_s8, 384 }
  0x1b   : > { %v741_v16 = vrot.slane %v1524_v13, %v1812_v5  ;;  %v651_v19 = vrot.slane %v644_v18, %v1812_v5  ;;  %1516 = vst.sshfl [vmem:[#allocation2 + $0x14] sm:$0x3 pattern:$0x76325410] %v503_v22  ;;  %vm338_vm9 = vcmask 900096   ;;  %vm928_vm10 = vcmask 293888  }
  0x1c   : > { %486 = vrot.lane.b32.xlu0 %v478_v7, %s1721_s10  ;;  %362 = vrot.lane.b32.xlu1 %v478_v7, %s1722_s11  ;;  %vm1258_vm11 = vcmask 523264  }
  0x20   : > { %424 = vrot.lane.b32.xlu0 %v478_v7, %s1723_s12  ;;  %395 = vrot.lane.b32.xlu1 %v478_v7, %s1724_s13 }
  0x24   : > { %488 = vrot.lane.b32.xlu0 %v485_v9, %s1721_s10  ;;  %364 = vrot.lane.b32.xlu1 %v485_v9, %s1722_s11 }
  0x28   : > { %393 = vrot.lane.b32.xlu0 %v385_v11, %s1724_s13  ;;  %426 = vrot.lane.b32.xlu1 %v485_v9, %s1723_s12 }
  0x2c   : > { %455 = vrot.lane.b32.xlu0 %v385_v11, %s1725_s14  ;;  %457 = vrot.lane.b32.xlu1 %v478_v7, %s1725_s14 }
  0x30   : > { %270 = vrot.lane.b32.xlu1 %v478_v7, %s1726_s15  ;;  %268 = vrot.lane.b32.xlu0 %v385_v11, %s1726_s15 }
  0x34   : > { %302 = vrot.lane.b32.xlu1 %v485_v9, %s1727_s16  ;;  %300 = vrot.lane.b32.xlu0 %v478_v7, %s1727_s16 }
  0x38   : > { %333 = vrot.lane.b32.xlu1 %v478_v7, %s1728_s17  ;;  %331 = vrot.lane.b32.xlu0 %v385_v11, %s1728_s17 }
  0x3c   : > { %751 = vrot.lane.b32.xlu1 %v748_v15, %s1721_s10  ;;  %749 = vrot.lane.b32.xlu0 %v741_v16, %s1721_s10 }
  0x40   : > { %631 = vrot.lane.b32.xlu1 %v748_v15, %s1722_s11  ;;  %629 = vrot.lane.b32.xlu0 %v741_v16, %s1722_s11 }
  0x44   : > { %661 = vrot.lane.b32.xlu1 %v741_v16, %s1724_s13  ;;  %659 = vrot.lane.b32.xlu0 %v651_v19, %s1724_s13 }
  0x48   : > { %691 = vrot.lane.b32.xlu1 %v748_v15, %s1723_s12  ;;  %689 = vrot.lane.b32.xlu0 %v741_v16, %s1723_s12 }
  0x4c   : > { %721 = vrot.lane.b32.xlu1 %v741_v16, %s1725_s14  ;;  %719 = vrot.lane.b32.xlu0 %v651_v19, %s1725_s14  ;;  %s218_s14 = sand.u32 1, %s1710_s19  }
  0x4d   : > { %s2135_s22 = scalar_lea.sflag [#allocation4], %s218_s14 }
  0x50   : > { %541 = vrot.lane.b32.xlu1 %v741_v16, %s1726_s15  ;;  %539 = vrot.lane.b32.xlu0 %v651_v19, %s1726_s15  ;;  %s1572_s15 = smul.u32 12, %s218_s14 }
  0x54   : > { %571 = vrot.lane.b32.xlu1 %v748_v15, %s1727_s16  ;;  %569 = vrot.lane.b32.xlu0 %v741_v16, %s1727_s16  ;;  %s220_s16 = scalar_lea.vmem [#allocation3], %s1572_s15 }
  0x58   : > { %601 = vrot.lane.b32.xlu1 %v741_v16, %s1728_s17  ;;  %599 = vrot.lane.b32.xlu0 %v651_v19, %s1728_s17  ;;  %s1443_s17 = sshll.u32 %s220_s16, 4  ;;  %s2128_s17 = int_to_ptr.vmem [resolvable:$true] %s1443_s17 }
  0x59   : > { %s1658_s6 = scalar_lea.vmem %s2128_s17, 192  ;;  %p1665_p0 = scmp.lt.s32.totalorder %s2128_s17, %s1663_s8 }
  0x5a   : > { %p1659_p11 = scmp.ne.s32.totalorder %s2128_s17, %s1658_s6  ;;  %p1666_p1 = scmp.lt.s32.totalorder %s1664_s9, %s1658_s6 }
  0x5c   : > { %830 = vperm.xlu1 %1626, %v792_v23   ;;  %825 = vperm.xlu0 %1625, %v791_v24   ;;  %p1660_p12 = pnand %p1659_p11, %p1801_p5  ;;  %p1667_p2 = por %p1666_p1, %p1665_p0 }
  0x5e   : > { %p1661_p13 = pneg %p1660_p12 }
  0x60   : > { %815 = vperm.xlu1 %1626, %v789_v25   ;;  %820 = vperm.xlu0 %1625, %v790_v26   ;;  %p1668_p3 = pnand %p1667_p2, %p1661_p13 }
  0x64   : > { %805 = vperm.xlu1 %1626, %v787_v27   ;;  %810 = vperm.xlu0 %1625, %v788_v28  }
  0x68   : > { %795 = vperm.xlu1 %1626, %v785_v29   ;;  %800 = vperm.xlu0 %1625, %v786_v30  }
  0x6c   : > { %1255 = vperm.xlu1 %1626, %v1252_v31  }
  0x8e   : > { %v487_v32 = vpop.permute.xlu0 %486  ;;  %v363_v33 = vpop.permute.xlu1 %362 }
  0x8f   : > { %v490_v40 = vrot.slane %v487_v32, 4  ;;  %v366_v41 = vrot.slane %v363_v33, 4 }
  0x92   : > { %v425_v34 = vpop.permute.xlu0 %424  ;;  %v396_v35 = vpop.permute.xlu1 %395 }
  0x93   : > { %v398_v36 = vrot.slane %v396_v35, 4  ;;  %v428_v52 = vrot.slane %v425_v34, 4 }
  0x95   : > { %v402_v37 = vsel %vm400_vm0, %v396_v35, %v398_v36 }
  0x96   : > { %406 = vst [vmem:[#allocation2 + $0x38] sm:$0xc] %v402_v37  ;;  %v489_v38 = vpop.permute.xlu0 %488  ;;  %v365_v39 = vpop.permute.xlu1 %364 }
  0x97   : > { %v491_v42 = vrot.slane %v489_v38, 4  ;;  %v367_v43 = vrot.slane %v365_v39, 4 }
  0x99   : > { %v492_v44 = vsel %vm274_vm1, %v490_v40, %v491_v42  ;;  %v495_v45 = vsel %vm493_vm2, %v489_v38, %v491_v42  ;;  %v368_v46 = vsel %vm274_vm1, %v366_v41, %v367_v43  ;;  %v371_v47 = vsel %vm369_vm3, %v365_v39, %v367_v43 }
  0x9a   : > { %v494_v48 = vsel %vm493_vm2, %v487_v32, %v492_v44  ;;  %499 = vst [vmem:[#allocation2 + $0x68] sm:$0x3] %v495_v45  ;;  %v370_v49 = vsel %vm369_vm3, %v363_v33, %v368_v46  ;;  %375 = vst [vmem:[#allocation2 + $0x38] sm:$0x3] %v371_v47  ;;  %v394_v50 = vpop.permute.xlu0 %393  ;;  %v427_v51 = vpop.permute.xlu1 %426 }
  0x9b   : > { %498 = vst [vmem:[#allocation2 + $0x60] sm:$0x33] %v494_v48  ;;  %374 = vst [vmem:[#allocation2 + $0x30] sm:$0x33] %v370_v49  ;;  %v397_v53 = vrot.slane %v394_v50, 4  ;;  %v429_v54 = vrot.slane %v427_v51, 4 }
  0x9d   : > { %v399_v55 = vsel %vm274_vm1, %v397_v53, %v398_v36  ;;  %v430_v56 = vsel %vm274_vm1, %v428_v52, %v429_v54  ;;  %v433_v57 = vsel %vm431_vm4, %v427_v51, %v429_v54  ;;  %v1927_v52 = vld [vmem:[%s2176_s1] sm:$0xff]  }
  0x9e   : > { %v401_v58 = vsel %vm400_vm0, %v394_v50, %v399_v55  ;;  %v432_v59 = vsel %vm431_vm4, %v425_v34, %v430_v56  ;;  %437 = vst [vmem:[#allocation2 + $0x50] sm:$0x3] %v433_v57  ;;  %v456_v60 = vpop.permute.xlu0 %455  ;;  %v458_v61 = vpop.permute.xlu1 %457 }
  0x9f   : > { %405 = vst [vmem:[#allocation2 + $0x30] sm:$0xcc] %v401_v58  ;;  %436 = vst [vmem:[#allocation2 + $0x48] sm:$0x33] %v432_v59  ;;  %v459_v62 = vrot.slane %v456_v60, 4  ;;  %v460_v63 = vrot.slane %v458_v61, 4 }
  0xa1   : > { %v461_v0 = vsel %vm274_vm1, %v459_v62, %v460_v63  ;;  %v464_v1 = vsel %vm462_vm5, %v458_v61, %v460_v63 }
  0xa2   : > { %v463_v2 = vsel %vm462_vm5, %v456_v60, %v461_v0  ;;  %468 = vst [vmem:[#allocation2 + $0x50] sm:$0xc] %v464_v1  ;;  %v271_v3 = vpop.permute.xlu1 %270  ;;  %v269_v4 = vpop.permute.xlu0 %268  ;;  %v782_v6 = vld [vmem:[#allocation2 + $0x60] sm:$0x33] }
  0xa3   : > { %467 = vst [vmem:[#allocation2 + $0x48] sm:$0xcc] %v463_v2  ;;  %v273_v7 = vrot.slane %v271_v3, 4  ;;  %v272_v8 = vrot.slane %v269_v4, 4  ;;  %v1542_v9 = vcombine.high %v782_v6, %v782_v6  ;;  %v1541_v10 = vcombine.low %v782_v6, %v782_v6 }
  0xa5   : > { %v278_v11 = vsel %vm276_vm6, %v271_v3, %v273_v7  ;;  %v275_v12 = vsel %vm274_vm1, %v272_v8, %v273_v7  ;;  %1547 = vmatprep.subr.msk.bf16.mxu0 %vm941_vm7, %v1542_v9  ;;  %v943_v13 = vsel %vm941_vm7, %v1541_v10, 0 }
  0xa6   : > { %282 = vst [vmem:[#allocation2 + $0x8] sm:$0xc] %v278_v11  ;;  %v277_v14 = vsel %vm276_vm6, %v269_v4, %v275_v12  ;;  %971 = vmatpush1.bf16.msra.mxu0 %v943_v13  ;;  %v303_v15 = vpop.permute.xlu1 %302  ;;  %v301_v16 = vpop.permute.xlu0 %300  ;;  %v1945_v12 = vld [vmem:[%s2176_s1 + $0x8] sm:$0xff]  }
  0xa7   : > { %281 = vst [vmem:[#allocation2] sm:$0xcc] %v277_v14  ;;  %v305_v18 = vrot.slane %v303_v15, 4  ;;  %v304_v19 = vrot.slane %v301_v16, 4 }
  0xa9   : > { %v309_v20 = vsel %vm307_vm8, %v303_v15, %v305_v18  ;;  %v306_v21 = vsel %vm274_vm1, %v304_v19, %v305_v18 }
  0xaa   : > { %313 = vst [vmem:[#allocation2 + $0x20] sm:$0x3] %v309_v20  ;;  %v308_v22 = vsel %vm307_vm8, %v301_v16, %v306_v21  ;;  %v334_v23 = vpop.permute.xlu1 %333  ;;  %v332_v24 = vpop.permute.xlu0 %331  ;;  %v1633_v25 = vld [vmem:[#allocation2 + $0x34] ss:$24 sps:$4 sm:$0xff]   ;;  %v1635_v26 = vld [vmem:[#allocation2 + $0x30] ss:$24 sps:$4 sm:$0xff]  }
  0xab   : > { %312 = vst [vmem:[#allocation2 + $0x18] sm:$0x33] %v308_v22  ;;  %v336_v27 = vrot.slane %v334_v23, 4  ;;  %v335_v28 = vrot.slane %v332_v24, 4  ;;  %972 = vmatprep.subr.bf16.mxu0 %v1633_v25 }
  0xac   : > { %973 = vmatpush1.bf16.msra.mxu0 %v1635_v26 }
  0xad   : > { %v340_v29 = vsel %vm338_vm9, %v334_v23, %v336_v27  ;;  %v337_v30 = vsel %vm274_vm1, %v335_v28, %v336_v27  ;;  %v1645_v28 = vld [vmem:[%s2176_s1 + $0x10] sm:$0xff]  }
  0xae   : > { %344 = vst [vmem:[#allocation2 + $0x20] sm:$0xc] %v340_v29  ;;  %v339_v31 = vsel %vm338_vm9, %v332_v24, %v337_v30  ;;  %v752_v32 = vpop.permute.xlu1 %751  ;;  %v750_v33 = vpop.permute.xlu0 %749 }
  0xaf   : > { %343 = vst [vmem:[#allocation2 + $0x18] sm:$0xcc] %v339_v31  ;;  %v754_v34 = vrot.slane %v752_v32, 4  ;;  %v753_v35 = vrot.slane %v750_v33, 4 }
  0xb1   : > { %v757_v36 = vsel %vm493_vm2, %v752_v32, %v754_v34  ;;  %v755_v37 = vsel %vm274_vm1, %v753_v35, %v754_v34 }
  0xb2   : > { %761 = vst [vmem:[#allocation2 + $0x74] sm:$0x3] %v757_v36  ;;  %v756_v38 = vsel %vm493_vm2, %v750_v33, %v755_v37  ;;  %v632_v39 = vpop.permute.xlu1 %631  ;;  %v630_v40 = vpop.permute.xlu0 %629 }
  0xb3   : > { %760 = vst [vmem:[#allocation2 + $0x6c] sm:$0x33] %v756_v38  ;;  %v634_v41 = vrot.slane %v632_v39, 4  ;;  %v633_v42 = vrot.slane %v630_v40, 4 }
  0xb5   : > { %v637_v43 = vsel %vm369_vm3, %v632_v39, %v634_v41  ;;  %v635_v44 = vsel %vm274_vm1, %v633_v42, %v634_v41  ;;  %v1651_v39 = vld [vmem:[#allocation2 + $0x38] ss:$24 sps:$4 sm:$0xff]  }
  0xb6   : > { %641 = vst [vmem:[#allocation2 + $0x44] sm:$0x3] %v637_v43  ;;  %v636_v45 = vsel %vm369_vm3, %v630_v40, %v635_v44  ;;  %v662_v46 = vpop.permute.xlu1 %661  ;;  %v660_v47 = vpop.permute.xlu0 %659  ;;  %v1636_v48 = vld [vmem:[#allocation2 + $0x4] ss:$24 sps:$4 sm:$0xff]   ;;  %v1638_v49 = vld [vmem:[#allocation2] ss:$24 sps:$4 sm:$0xff]  }
  0xb7   : > { %640 = vst [vmem:[#allocation2 + $0x3c] sm:$0x33] %v636_v45  ;;  %v664_v50 = vrot.slane %v662_v46, 4  ;;  %v663_v51 = vrot.slane %v660_v47, 4  ;;  %974 = vmatprep.subr.bf16.mxu0 %v1636_v48  ;;  %v1652_v43 = vld [vmem:[%s2176_s1 + $0x18] sm:$0xff]  }
  0xb8   : > { %975 = vmatpush1.bf16.msra.mxu0 %v1638_v49 }
  0xb9   : > { %v667_v53 = vsel %vm400_vm0, %v662_v46, %v664_v50  ;;  %v665_v54 = vsel %vm274_vm1, %v663_v51, %v664_v50 }
  0xba   : > { %671 = vst [vmem:[#allocation2 + $0x44] sm:$0xc] %v667_v53  ;;  %v666_v55 = vsel %vm400_vm0, %v660_v47, %v665_v54  ;;  %v692_v56 = vpop.permute.xlu1 %691  ;;  %v690_v57 = vpop.permute.xlu0 %689  ;;  %v783_v58 = vld [vmem:[#allocation2 + $0x68] sm:$0x33]  ;;  %v784_v59 = vld [vmem:[#allocation2 + $0x70] sm:$0x33] }
  0xbb   : > { %670 = vst [vmem:[#allocation2 + $0x3c] sm:$0xcc] %v666_v55  ;;  %v694_v60 = vrot.slane %v692_v56, 4  ;;  %v693_v61 = vrot.slane %v690_v57, 4  ;;  %v1544_v62 = vcombine.high %v783_v58, %v783_v58  ;;  %v1546_v63 = vcombine.high %v784_v59, %v784_v59  ;;  %1548 = vmatmul.mubr.msk.bf16.vlgmr.msra.gmra.mxu0 %vm928_vm10, %v1927_v52 }
  0xbc   : > { %v1543_v0 = vcombine.low %v783_v58, %v783_v58  ;;  %v1545_v1 = vcombine.low %v784_v59, %v784_v59  ;;  %1002 = vmatprep.mubr.bf16.mxu0 %v1729_v17 }
  0xbd   : > { %v697_v2 = vsel %vm431_vm4, %v692_v56, %v694_v60  ;;  %v695_v3 = vsel %vm274_vm1, %v693_v61, %v694_v60  ;;  %1552 = vmatprep.subr.msk.bf16.mxu1 %vm941_vm7, %v1544_v62  ;;  %1557 = vmatprep.subr.msk.bf16.mxu0 %vm941_vm7, %v1546_v63 }
  0xbe   : > { %701 = vst [vmem:[#allocation2 + $0x5c] sm:$0x3] %v697_v2  ;;  %v696_v4 = vsel %vm431_vm4, %v690_v57, %v695_v3  ;;  %v722_v6 = vpop.permute.xlu1 %721  ;;  %v949_v7 = vsel %vm941_vm7, %v1543_v0, 0  ;;  %v720_v8 = vpop.permute.xlu0 %719  ;;  %v955_v9 = vsel %vm941_vm7, %v1545_v1, 0 }
  0xbf   : > { %700 = vst [vmem:[#allocation2 + $0x54] sm:$0x33] %v696_v4  ;;  %v724_v10 = vrot.slane %v722_v6, 4  ;;  %1044 = vmatpush1.bf16.msra.mxu1 %v949_v7  ;;  %v723_v11 = vrot.slane %v720_v8, 4  ;;  %1117 = vmatpush1.bf16.msra.mxu0 %v955_v9 }
  0xc1   : > { %v727_v13 = vsel %vm462_vm5, %v722_v6, %v724_v10  ;;  %v725_v14 = vsel %vm274_vm1, %v723_v11, %v724_v10 }
  0xc2   : > { %731 = vst [vmem:[#allocation2 + $0x5c] sm:$0xc] %v727_v13  ;;  %v726_v15 = vsel %vm462_vm5, %v720_v8, %v725_v14  ;;  %v542_v16 = vpop.permute.xlu1 %541  ;;  %v540_v18 = vpop.permute.xlu0 %539 }
  0xc3   : > { %730 = vst [vmem:[#allocation2 + $0x54] sm:$0xcc] %v726_v15  ;;  %v544_v19 = vrot.slane %v542_v16, 4  ;;  %v543_v20 = vrot.slane %v540_v18, 4  ;;  %1549 = vmatmul.mubr.msk.bf16.gmra.mxu0 %vm928_vm10, %v1945_v12 }
  0xc4   : > { %1012 = vmatprep.mubr.bf16.mxu0 %v1729_v17 }
  0xc5   : > { %v547_v21 = vsel %vm276_vm6, %v542_v16, %v544_v19  ;;  %v545_v22 = vsel %vm274_vm1, %v543_v20, %v544_v19 }
  0xc6   : > { %551 = vst [vmem:[#allocation2 + $0x14] sm:$0xc] %v547_v21  ;;  %v546_v23 = vsel %vm276_vm6, %v540_v18, %v545_v22  ;;  %v572_v24 = vpop.permute.xlu1 %571  ;;  %v570_v25 = vpop.permute.xlu0 %569 }
  0xc7   : > { %550 = vst [vmem:[#allocation2 + $0xc] sm:$0xcc] %v546_v23  ;;  %v574_v26 = vrot.slane %v572_v24, 4  ;;  %v573_v27 = vrot.slane %v570_v25, 4 }
  0xc9   : > { %v577_v29 = vsel %vm307_vm8, %v572_v24, %v574_v26  ;;  %v575_v30 = vsel %vm274_vm1, %v573_v27, %v574_v26  ;;  %v1650_v38 = vld [vmem:[#allocation2 + $0x44] ss:$24 sps:$4 sm:$0xff]  }
  0xca   : > { %581 = vst [vmem:[#allocation2 + $0x2c] sm:$0x3] %v577_v29  ;;  %v576_v31 = vsel %vm307_vm8, %v570_v25, %v575_v30  ;;  %v602_v32 = vpop.permute.xlu1 %601  ;;  %v600_v33 = vpop.permute.xlu0 %599  ;;  %v1646_v34 = vld [vmem:[#allocation2 + $0x3c] ss:$24 sps:$4 sm:$0xff]   ;;  %v1648_v37 = vld [vmem:[#allocation2 + $0x40] ss:$24 sps:$4 sm:$0xff]   ;;  %1118 = vmatprep.subr.bf16.mxu0 %v1650_v38 }
  0xcb   : > { %580 = vst [vmem:[#allocation2 + $0x24] sm:$0x33] %v576_v31  ;;  %v604_v35 = vrot.slane %v602_v32, 4  ;;  %v603_v36 = vrot.slane %v600_v33, 4  ;;  %1550 = vmatmul.mubr.msk.bf16.gmra.mxu0 %vm928_vm10, %v1645_v28  ;;  %1045 = vmatprep.subr.bf16.mxu1 %v1646_v34 }
  0xcc   : > { %1022 = vmatprep.mubr.bf16.mxu0 %v1729_v17  ;;  %1046 = vmatpush1.bf16.msra.mxu1 %v1651_v39 }
  0xcd   : > { %v607_v40 = vsel %vm338_vm9, %v602_v32, %v604_v35  ;;  %v605_v41 = vsel %vm274_vm1, %v603_v36, %v604_v35  ;;  %1119 = vmatpush1.bf16.msra.mxu0 %v1648_v37 }
  0xce   : > { %611 = vst [vmem:[#allocation2 + $0x2c] sm:$0xc] %v607_v40  ;;  %v606_v42 = vsel %vm338_vm9, %v600_v33, %v605_v41  ;;  %v771_v44 = vld [vmem:[#allocation2 + $0x8] sm:$0xff] }
  0xcf   : > { %610 = vst [vmem:[#allocation2 + $0x24] sm:$0xcc] %v606_v42 }
  0xd3   : > { %1551 = vmatmul.mubr.msk.bf16.gmra.mxu0 %vm928_vm10, %v1652_v43 }
  0xd4   : > { %1138 = vmatprep.mubr.bf16.mxu0 %v1729_v17 }
  0xd5   : > { %v1657_v48 = vld [vmem:[#allocation2 + $0x14] ss:$24 sps:$4 sm:$0xff]  }
  0xd6   : > { %v774_v45 = vld [vmem:[#allocation2 + $0x20] sm:$0xff]  ;;  %v1655_v47 = vld [vmem:[#allocation2 + $0x10] ss:$24 sps:$4 sm:$0xff]   ;;  %1120 = vmatprep.subr.bf16.mxu0 %v1657_v48 }
  0xd7   : > { %v1653_v46 = vld [vmem:[#allocation2 + $0xc] ss:$24 sps:$4 sm:$0xff]   ;;  %v1531_v49 = vcombine.low %v771_v44, %v774_v45  ;;  %1121 = vmatpush1.bf16.msra.mxu0 %v1655_v47  ;;  %v1994_v59 = vpop.permute.xlu1 %830  ;;  %v1996_v60 = vpop.permute.xlu0 %825 }
  0xd8   : > { %1047 = vmatprep.subr.bf16.mxu1 %v1653_v46 }
  0xd9   : > { %1048 = vmatpush1.bf16.msra.mxu1 %v1531_v49 }
  0xdb   : > { %1558 = vmatmul.mubr.msk.bf16.vlgmr.msra.gmra.mxu0 %vm928_vm10, %v1927_v52  ;;  %v1998_v0 = vpop.permute.xlu1 %815  ;;  %v2000_v1 = vpop.permute.xlu0 %820 }
  0xdc   : > { %1553 = vmatmul.mubr.msk.bf16.vlgmr.msra.gmra.mxu1 %vm928_vm10, %v1927_v52  ;;  %1148 = vmatprep.mubr.bf16.mxu0 %v1729_v17 }
  0xdd   : > { %1075 = vmatprep.mubr.bf16.mxu1 %v1729_v17 }
  0xdf   : > { %v2002_v6 = vpop.permute.xlu1 %805  ;;  %v2007_v10 = vpop.permute.xlu0 %810 }
  0xe3   : > { %1559 = vmatmul.mubr.msk.bf16.gmra.mxu0 %vm928_vm10, %v1945_v12  ;;  %v2021_v27 = vpop.permute.xlu1 %795  ;;  %v2024_v32 = vpop.permute.xlu0 %800 }
  0xe4   : > { %1554 = vmatmul.mubr.msk.bf16.gmra.mxu1 %vm928_vm10, %v1945_v12  ;;  %1158 = vmatprep.mubr.bf16.mxu0 %v1729_v17 }
  0xe5   : > { %1085 = vmatprep.mubr.bf16.mxu1 %v1729_v17 }
  0xeb   : > { %1560 = vmatmul.mubr.msk.bf16.gmra.mxu0 %vm928_vm10, %v1645_v28 }
  0xec   : > { %1555 = vmatmul.mubr.msk.bf16.gmra.mxu1 %vm928_vm10, %v1645_v28  ;;  %1168 = vmatprep.mubr.bf16.mxu0 %v1729_v17 }
  0xed   : > { %1095 = vmatprep.mubr.bf16.mxu1 %v1729_v17 }
  0xf3   : > { %1561 = vmatmul.mubr.msk.bf16.gmra.mxu0 %vm928_vm10, %v1652_v43 }
  0xf4   : > { %1556 = vmatmul.mubr.msk.bf16.gmra.mxu1 %vm928_vm10, %v1652_v43  ;;  %1376 = vmatprep.mubr.bf16.mxu0 %v1729_v17 }
  0xf5   : > { %1294 = vmatprep.mubr.bf16.mxu1 %v1729_v17 }
 0x17b   : > { %v1992_v50 = vpop.f32.mrf.mxu0 }
 0x17d   : > { %v996_v51 = vpop.f32.mrf.mxu0 }
 0x17e   : > { %v997_v44 = vadd.f32 %v996_v51, %v2021_v27 }
 0x17f   : > { %v998_v52 = vpop.f32.mrf.mxu0 }
 0x180   : > { %v999_v47 = vadd.f32 %v998_v52, %v2024_v32  ;;  %v1180_v51 = vmax.f32 %v997_v44, 0.0 }
 0x181   : > { %v1000_v53 = vpop.f32.mrf.mxu0 }
 0x182   : > { %v1001_v37 = vadd.f32 %v1000_v53, %v2024_v32 }
 0x183   : > { %v1004_v54 = vpop.f32.mrf.mxu0 }
 0x184   : > { %v1005_v41 = vadd.f32 %v1004_v54, %v2002_v6  ;;  %v995_v54 = vadd.f32 %v1992_v50, %v2021_v27 }
 0x185   : > { %v1006_v55 = vpop.f32.mrf.mxu0 }
 0x186   : > { %v1007_v28 = vadd.f32 %v1006_v55, %v2002_v6  ;;  %v1186_v55 = vmax.f32 %v1001_v37, 0.0 }
 0x187   : > { %v1008_v56 = vpop.f32.mrf.mxu0 }
 0x188   : > { %v1009_v33 = vadd.f32 %v1008_v56, %v2007_v10  ;;  %v1192_v45 = vmax.f32 %v1007_v28, 0.0 }
 0x189   : > { %v1010_v57 = vpop.f32.mrf.mxu0 }
 0x18a   : > { %v1011_v19 = vadd.f32 %v1010_v57, %v2007_v10  ;;  %v1197_v48 = vmax.f32 %v1009_v33, 0.0 }
 0x18b   : > { %v1014_v58 = vpop.f32.mrf.mxu0 }
 0x18c   : > { %v1015_v24 = vadd.f32 %v1014_v58, %v1998_v0  ;;  %v1198_v38 = vmax.f32 %v1011_v19, 0.0  ;;  %v1191_v58 = vmax.f32 %v1005_v41, 0.0 }
 0x18d   : > { %v1016_v61 = vpop.f32.mrf.mxu0 }
 0x18e   : > { %v1017_v13 = vadd.f32 %v1016_v61, %v1998_v0  ;;  %v1203_v42 = vmax.f32 %v1015_v24, 0.0  ;;  %v1235_v56 = vpack.c.bf16 %v1198_v38, %v1192_v45 }
 0x18f   : > { %v1018_v62 = vpop.f32.mrf.mxu0 }
 0x190   : > { %v1019_v15 = vadd.f32 %v1018_v62, %v2000_v1  ;;  %v1204_v29 = vmax.f32 %v1017_v13, 0.0 }
 0x191   : > { %v1020_v63 = vpop.f32.mrf.mxu0 }
 0x192   : > { %v1021_v7 = vadd.f32 %v1020_v63, %v2000_v1  ;;  %v1209_v34 = vmax.f32 %v1019_v15, 0.0  ;;  %v1185_v63 = vmax.f32 %v999_v47, 0.0 }
 0x193   : > { %v1024_v2 = vpop.f32.mrf.mxu0 }
 0x194   : > { %v1025_v11 = vadd.f32 %v1024_v2, %v1996_v60  ;;  %v1210_v20 = vmax.f32 %v1021_v7, 0.0  ;;  %v1240_v49 = vpack.c.bf16 %v1209_v34, %v1203_v42  ;;  %v1234_v2 = vpack.c.bf16 %v1197_v48, %v1191_v58 }
 0x195   : > { %v1026_v3 = vpop.f32.mrf.mxu0  ;;  %v1179_v7 = vmax.f32 %v995_v54, 0.0 }
 0x196   : > { %v1027_v8 = vadd.f32 %v1026_v3, %v1996_v60  ;;  %v1215_v25 = vmax.f32 %v1025_v11, 0.0  ;;  %v1241_v39 = vpack.c.bf16 %v1210_v20, %v1204_v29  ;;  %v1229_v3 = vpack.c.bf16 %v1186_v55, %v1180_v51 }
 0x197   : > { %v1028_v4 = vpop.f32.mrf.mxu0  ;;  %v1228_v11 = vpack.c.bf16 %v1185_v63, %v1179_v7 }
 0x198   : > { %v1029_v9 = vadd.f32 %v1028_v4, %v1994_v59  ;;  %v1216_v21 = vmax.f32 %v1027_v8, 0.0 }
 0x199   : > { %v1030_v12 = vpop.f32.mrf.mxu0 }
 0x19a   : > { %v1031_v14 = vadd.f32 %v1030_v12, %v1994_v59  ;;  %v1221_v16 = vmax.f32 %v1029_v9, 0.0 }
 0x19b   : > { %v2016_v23 = vpop.f32.mrf.mxu0 }
 0x19c   : > { %v2013_v18 = vpop.f32.mrf.mxu1  ;;  %v1222_v22 = vmax.f32 %v1031_v14, 0.0  ;;  %v1246_v35 = vpack.c.bf16 %v1221_v16, %v1215_v25  ;;  %v2044_v14 = vld [vmem:[%s2178_s3] sm:$0x1] }
 0x19d   : > { %v1142_v31 = vpop.f32.mrf.mxu0 }
 0x19e   : > { %v2019_v26 = vpop.f32.mrf.mxu1  ;;  %v1247_v30 = vpack.c.bf16 %v1222_v22, %v1216_v21  ;;  %v2054_v28 = vadd.f32 %v1142_v31, %v2021_v27 }
 0x19f   : > { %v2030_v40 = vpop.f32.mrf.mxu0  ;;  %v2051_v25 = vadd.f32 %v2019_v26, %v2021_v27 }
 0x1a0   : > { %v2027_v36 = vpop.f32.mrf.mxu1  ;;  %1270 = vmatprep.subr.bf16.mxu1 %v1247_v30 }
 0x1a1   : > { %1271 = vmatpush1.bf16.msra.mxu1 %v1246_v35  ;;  %v1146_v46 = vpop.f32.mrf.mxu0 }
 0x1a2   : > { %v1073_v43 = vpop.f32.mrf.mxu1  ;;  %1272 = vmatprep.subr.bf16.mxu1 %v1241_v39  ;;  %v2060_v33 = vadd.f32 %v1146_v46, %v2024_v32 }
 0x1a3   : > { %v2037_v57 = vpop.f32.mrf.mxu0  ;;  %v2057_v30 = vadd.f32 %v1073_v43, %v2024_v32 }
 0x1a4   : > { %v2035_v53 = vpop.f32.mrf.mxu1 }
 0x1a5   : > { %1273 = vmatpush1.bf16.msra.mxu1 %v1240_v49  ;;  %v1152_v62 = vpop.f32.mrf.mxu0 }
 0x1a6   : > { %v1079_v61 = vpop.f32.mrf.mxu1  ;;  %1274 = vmatprep.subr.bf16.mxu1 %v1235_v56 }
 0x1a7   : > { %v1154_v4 = vpop.f32.mrf.mxu0  ;;  %v2063_v34 = vadd.f32 %v1079_v61, %v2002_v6 }
 0x1a8   : > { %v1081_v52 = vpop.f32.mrf.mxu1  ;;  %v2072_v31 = vadd.f32 %v1154_v4, %v2007_v10 }
 0x1a9   : > { %1275 = vmatpush1.bf16.msra.mxu1 %v1234_v2  ;;  %v1156_v9 = vpop.f32.mrf.mxu0  ;;  %v2069_v26 = vadd.f32 %v1081_v52, %v2007_v10 }
 0x1aa   : > { %v1083_v8 = vpop.f32.mrf.mxu1  ;;  %1276 = vmatprep.subr.bf16.mxu1 %v1229_v3  ;;  %v2078_v38 = vadd.f32 %v1156_v9, %v2007_v10 }
 0x1ab   : > { %v1160_v13 = vpop.f32.mrf.mxu0  ;;  %v2075_v37 = vadd.f32 %v1083_v8, %v2007_v10 }
 0x1ac   : > { %v1087_v12 = vpop.f32.mrf.mxu1 }
 0x1ad   : > { %1277 = vmatpush1.bf16.msra.mxu1 %v1228_v11  ;;  %v1162_v15 = vpop.f32.mrf.mxu0  ;;  %v1088_v41 = vadd.f32 %v1087_v12, %v1998_v0 }
 0x1ae   : > { %v1089_v50 = vpop.f32.mrf.mxu1  ;;  %v1163_v56 = vadd.f32 %v1162_v15, %v1998_v0 }
 0x1af   : > { %v1164_v19 = vpop.f32.mrf.mxu0  ;;  %v1090_v55 = vadd.f32 %v1089_v50, %v1998_v0 }
 0x1b0   : > { %v1091_v16 = vpop.f32.mrf.mxu1  ;;  %1562 = vmatmul.mubr.msk.bf16.vlgmr.msra.gmra.mxu1 %vm1258_vm11, %v2044_v14 }
 0x1b1   : > { %1335 = vmatprep.mubr.bf16.mxu1 %v1729_v17  ;;  %v1166_v21 = vpop.f32.mrf.mxu0  ;;  %v2066_v17 = vadd.f32 %v1152_v62, %v2002_v6  ;;  %v1092_v51 = vadd.f32 %v1091_v16, %v2000_v1  ;;  %v1165_v62 = vadd.f32 %v1164_v19, %v2000_v1  ;;  %v1206_v50 = vmax.f32 %v1090_v55, 0.0 }
 0x1b2   : > { %v1093_v20 = vpop.f32.mrf.mxu1  ;;  %v1167_v46 = vadd.f32 %v1166_v21, %v2000_v1  ;;  %v1208_v21 = vmax.f32 %v1163_v56, 0.0  ;;  %v1200_v19 = vmax.f32 %v2075_v37, 0.0  ;;  %v1194_v37 = vmax.f32 %v2063_v34, 0.0 }
 0x1b3   : > { %v1170_v24 = vpop.f32.mrf.mxu0  ;;  %v1094_v42 = vadd.f32 %v1093_v20, %v2000_v1  ;;  %v1211_v16 = vmax.f32 %v1092_v51, 0.0  ;;  %v1190_v34 = vmax.f32 %v2060_v33, 0.0  ;;  %v1256_v51 = vpop.permute.xlu1 %1255 }
 0x1b4   : > { %v1097_v22 = vpop.f32.mrf.mxu1  ;;  %v1171_v54 = vadd.f32 %v1170_v24, %v1996_v60  ;;  %v1214_v8 = vmax.f32 %v1167_v46, 0.0  ;;  %v1188_v46 = vmax.f32 %v2057_v30, 0.0  ;;  %v1184_v30 = vmax.f32 %v2054_v28, 0.0 }
 0x1b5   : > { %v1172_v35 = vpop.f32.mrf.mxu0  ;;  %v1098_v47 = vadd.f32 %v1097_v22, %v1996_v60  ;;  %v1212_v52 = vmax.f32 %v1094_v42, 0.0  ;;  %v1205_v42 = vmax.f32 %v1088_v41, 0.0  ;;  %v1199_v41 = vmax.f32 %v2069_v26, 0.0 }
 0x1b6   : > { %v1099_v29 = vpop.f32.mrf.mxu1  ;;  %v1173_v48 = vadd.f32 %v1172_v35, %v1996_v60  ;;  %v1219_v15 = vmax.f32 %v1171_v54, 0.0  ;;  %v1078_v35 = vadd.f32 %v2035_v53, %v2002_v6  ;;  %v1145_v53 = vadd.f32 %v2030_v40, %v2024_v32 }
 0x1b7   : > { %v1100_v43 = vadd.f32 %v1099_v29, %v1996_v60  ;;  %v1174_v45 = vpop.f32.mrf.mxu0  ;;  %v1217_v9 = vmax.f32 %v1098_v47, 0.0  ;;  %v1161_v60 = vadd.f32 %v1160_v13, %v1998_v0  ;;  %v1243_v24 = vpack.c.bf16 %v1212_v52, %v1206_v50 }
 0x1b8   : > { %v1101_v39 = vpop.f32.mrf.mxu1  ;;  %v1175_v49 = vadd.f32 %v1174_v45, %v1994_v59  ;;  %v1220_v11 = vmax.f32 %v1173_v48, 0.0  ;;  %v1245_v0 = vpack.c.bf16 %v1214_v8, %v1208_v21  ;;  %v1072_v13 = vadd.f32 %v2027_v36, %v2024_v32 }
 0x1b9   : > { %v1102_v44 = vadd.f32 %v1101_v39, %v1994_v59  ;;  %v1176_v61 = vpop.f32.mrf.mxu0  ;;  %v1218_v3 = vmax.f32 %v1100_v43, 0.0  ;;  %v1202_v39 = vmax.f32 %v2078_v38, 0.0  ;;  %v1151_v43 = vadd.f32 %v2037_v57, %v2002_v6 }
 0x1ba   : > { %v1103_v10 = vpop.f32.mrf.mxu1  ;;  %v1177_v2 = vadd.f32 %v1176_v61, %v1994_v59  ;;  %v1225_v4 = vmax.f32 %v1175_v49, 0.0  ;;  %v1196_v38 = vmax.f32 %v2066_v17, 0.0  ;;  %v1242_v45 = vpack.c.bf16 %v1211_v16, %v1205_v42 }
 0x1bb   : > { %v1104_v58 = vadd.f32 %v1103_v10, %v1994_v59  ;;  %v1223_v63 = vmax.f32 %v1102_v44, 0.0  ;;  %v1213_v59 = vmax.f32 %v1165_v62, 0.0  ;;  %v1207_v44 = vmax.f32 %v1161_v60, 0.0 }
 0x1bc   : > { %v1226_v12 = vmax.f32 %v1177_v2, 0.0  ;;  %v1250_v29 = vpack.c.bf16 %v1225_v4, %v1219_v15  ;;  %v1201_v36 = vmax.f32 %v2072_v31, 0.0  ;;  %v1237_v47 = vpack.c.bf16 %v1200_v19, %v1194_v37 }
 0x1bd   : > { %v1224_v7 = vmax.f32 %v1104_v58, 0.0  ;;  %v1248_v22 = vpack.c.bf16 %v1223_v63, %v1217_v9  ;;  %v1244_v6 = vpack.c.bf16 %v1213_v59, %v1207_v44  ;;  %v1068_v57 = vadd.f32 %v2013_v18, %v2021_v27 }
 0x1be   : > { %v1251_v1 = vpack.c.bf16 %v1226_v12, %v1220_v11  ;;  %v1193_v48 = vmax.f32 %v1078_v35, 0.0  ;;  %v1239_v49 = vpack.c.bf16 %v1202_v39, %v1196_v38  ;;  %v1141_v32 = vadd.f32 %v2016_v23, %v2021_v27 }
 0x1bf   : > { %v1249_v20 = vpack.c.bf16 %v1224_v7, %v1218_v3  ;;  %v1182_v40 = vmax.f32 %v2051_v25, 0.0  ;;  %v1195_v17 = vmax.f32 %v1151_v43, 0.0  ;;  %v1187_v26 = vmax.f32 %v1072_v13, 0.0 }
 0x1c0   : > { %1352 = vmatprep.subr.bf16.mxu0 %v1251_v1  ;;  %v1236_v31 = vpack.c.bf16 %v1199_v41, %v1193_v48  ;;  %v1189_v10 = vmax.f32 %v1145_v53, 0.0  ;;  %v1181_v33 = vmax.f32 %v1068_v57, 0.0  ;;  %v1233_v56 = vpack.c.bf16 %v1190_v34, %v1184_v30 }
 0x1c1   : > { %1311 = vmatprep.subr.bf16.mxu1 %v1249_v20  ;;  %1353 = vmatpush1.bf16.msra.mxu0 %v1250_v29  ;;  %v1231_v18 = vpack.c.bf16 %v1188_v46, %v1182_v40  ;;  %v1238_v55 = vpack.c.bf16 %v1201_v36, %v1195_v17  ;;  %v1183_v54 = vmax.f32 %v1141_v32, 0.0 }
 0x1c2   : > { %1312 = vmatpush1.bf16.msra.mxu1 %v1248_v22  ;;  %1354 = vmatprep.subr.bf16.mxu0 %v1245_v0  ;;  %v1230_v23 = vpack.c.bf16 %v1187_v26, %v1181_v33 }
 0x1c3   : > { %1313 = vmatprep.subr.bf16.mxu1 %v1243_v24  ;;  %v1232_v27 = vpack.c.bf16 %v1189_v10, %v1183_v54 }
 0x1c5   : > { %1355 = vmatpush1.bf16.msra.mxu0 %v1244_v6 }
 0x1c6   : > { %1314 = vmatpush1.bf16.msra.mxu1 %v1242_v45  ;;  %1356 = vmatprep.subr.bf16.mxu0 %v1239_v49 }
 0x1c7   : > { %1315 = vmatprep.subr.bf16.mxu1 %v1237_v47 }
 0x1c9   : > { %1357 = vmatpush1.bf16.msra.mxu0 %v1238_v55 }
 0x1ca   : > { %1316 = vmatpush1.bf16.msra.mxu1 %v1236_v31  ;;  %1358 = vmatprep.subr.bf16.mxu0 %v1233_v56 }
 0x1cb   : > { %1317 = vmatprep.subr.bf16.mxu1 %v1231_v18 }
 0x1cd   : > { %1359 = vmatpush1.bf16.msra.mxu0 %v1232_v27 }
 0x1ce   : > { %1318 = vmatpush1.bf16.msra.mxu1 %v1230_v23 }
 0x1d0   : > { %1564 = vmatmul.mubr.msk.bf16.vlgmr.msra.gmra.mxu0 %vm1258_vm11, %v2044_v14 }
 0x1d1   : > { %1563 = vmatmul.mubr.msk.bf16.vlgmr.msra.gmra.mxu1 %vm1258_vm11, %v2044_v14 }
 0x270   : > { %v1296_v25 = vpop.f32.mrf.mxu1 }
 0x271   : > { %v1297_v63 = vadd.f32 %v1296_v25, %v1256_v51 }
 0x272   : > { %v1298_v28 = vpop.f32.mrf.mxu1 }
 0x273   : > { %v1299_v62 = vadd.f32 %v1298_v28, %v1256_v51 }
 0x274   : > { %v1300_v58 = vpop.f32.mrf.mxu1 }
 0x275   : > { %v1388_v2 = vcombine.low %v1297_v63, %v1299_v62 }
 0x276   : > { %v1301_v61 = vpop.f32.mrf.mxu1 }
 0x277   : > { %v1395_v8 = vrot.slane %v1388_v2, %v1812_v5 }
 0x290   : > { %v1378_v4 = vpop.f32.mrf.mxu0 }
 0x291   : > { %v1337_v52 = vpop.f32.mrf.mxu1  ;;  %v1379_v14 = vadd.f32 %v1378_v4, %v1256_v51 }
 0x292   : > { %v1338_v3 = vadd.f32 %v1337_v52, %v1256_v51  ;;  %v1380_v12 = vpop.f32.mrf.mxu0 }
 0x293   : > { %v1339_v7 = vpop.f32.mrf.mxu1  ;;  %v1381_v60 = vadd.f32 %v1380_v12, %v1256_v51 }
 0x294   : > { %v1402_v9 = vrot.slane %v1338_v3, %v1812_v5  ;;  %v1340_v11 = vadd.f32 %v1339_v7, %v1256_v51  ;;  %v1382_v21 = vpop.f32.mrf.mxu0 }
 0x295   : > { %v1341_v50 = vpop.f32.mrf.mxu1  ;;  %v1423_v1 = vrot.slane %v1381_v60, %v1812_v5 }
 0x296   : > { %v1403_v15 = vcombine.low %v1395_v8, %v1402_v9  ;;  %v1409_v20 = vcombine.low %v1340_v11, %v1379_v14  ;;  %v1383_v19 = vpop.f32.mrf.mxu0 }
 0x297   : > { %v1342_v16 = vpop.f32.mrf.mxu1 }
 0x298   : > { %1405 = vst [vmem:[%s220_s16] sm:$0x3f] %v1403_v15  ;;  %v1416_v22 = vrot.slane %v1409_v20, %v1812_v5 }
 0x29a   : > { %v1424_v59 = vcombine.low %v1416_v22, %v1423_v1 }
 0x29c   : > { %1565 = vst [vmem:[%s220_s16 + $0x6] sm:$0x3f] %v1424_v59 }
 0x29d   : > { %1671 = shalt.err (!%p1668_p3)
}
 0x29e   : > { %s1672_s10 = scalar_lea.hbm %s2133_s30, 192  ;;  %s1676_s13 = scalar_lea.hbm %s2180_s5, 384 }
 0x29f   : > { %p1673_p4 = scmp.ne.s32.totalorder %s2133_s30, %s1672_s10  ;;  %p1677_p9 = scmp.lt.s32.totalorder %s2133_s30, %s2180_s5 }
 0x2a0   : > { %p1678_p10 = scmp.lt.s32.totalorder %s1676_s13, %s1672_s10 }
 0x2a1   : > { %p1674_p7 = pnand %p1673_p4, %p1801_p5 }
 0x2a2   : > { %p1679_p11 = por %p1678_p10, %p1677_p9 }
 0x2a3   : > { %p1675_p8 = pneg %p1674_p7 }
 0x2a5   : > { %p1680_p12 = pnand %p1679_p11, %p1675_p8 }
 0x2a7   : > { %1683 = shalt.err (!%p1680_p12)
}
 0x2a8   : > { %s1731_s16 = smov 96   ;;  %s1732_s23 = smov 6  }
 0x2a9   : > { %1574 = dma.vmem_to_hbm [thread:$0]  (%p1801_p5), %s2128_s17, 192, %s2133_s30, %s2135_s22, %s1731_s16, %s1731_s16, %s1732_s23  }
 0x2aa PF: > { %p1580_p13 = scmp.ge.s32.totalorder %s1718_s21, 2  ;;  %s1458_s25 = sand.u32 1, %s1706_s18  }
 0x2ab   : > { %s1459_s26 = scalar_lea.sflag [#allocation4], %s1458_s25 }
 0x2ac   : > { %p1577_p0 = pnand %p1580_p13, %p1805_p6 }
 0x2ae   : > { %p1578_p1 = pneg %p1577_p0 }
 0x2b0   : > { %1701 = dma.done.wait (%p1578_p1), %s1459_s26, 192  }
 0x2b1   : > { %1703 = vsyncadd (%p1578_p1), %s1459_s26, 4294967104  ;;  %p15_p2 = scmp.ge.s32.totalorder %s1788_s24, 4   ;;  %s2183_s18 = smov %s1710_s19 }
 0x2b2   : > { %s2184_s19 = smov %s1714_s20  ;;  %s2185_s20 = smov %s1799_s27 }
 0x2b3   : > { %s2186_s21 = smov %s1788_s24  ;;  %17 = sbr.rel (!%p15_p2) target bundleno = 3 (0x3), region = 77 }
 0x2b8   :  { %1464 = vsyncpa [#allocation4], 1 }
 0x2b9   :  { %1466 = vsyncpa [#allocation4 + $0x1], 1 }

</bundles_post_ra>
